<compile_context>
chip_gen: v6e
topology: v6e:2x2x1
jax: 0.10.0
libtpu: 0.0.40
codegen_flags: <defaults>
</compile_context>

<pallas_src>
import jax
import jax.numpy as jnp
from jax.experimental import pallas as pl
from jax.experimental.pallas import tpu as pltpu


def discriminator_kernel(x_ref, w1_ref, w2_ref, w3_ref, w4_ref, o_ref):
    lk = jnp.float32(0.01)

    # Layers 1-3: MXU matmuls (bf16 operands, f32 accumulation), f32 LeakyReLU.
    h = jnp.dot(x_ref[...], w1_ref[...], preferred_element_type=jnp.float32)
    h = jnp.where(h > 0, h, lk * h)
    h = jnp.dot(h.astype(w2_ref.dtype), w2_ref[...],
                preferred_element_type=jnp.float32)
    h = jnp.where(h > 0, h, lk * h)
    h = jnp.dot(h.astype(w3_ref.dtype), w3_ref[...],
                preferred_element_type=jnp.float32)
    h = jnp.where(h > 0, h, lk * h)

    # Layer 4 (d -> 1): skip the N=1 MXU matmul; VPU multiply + lane reduction
    # in f32. w4_ref holds the weight as a (1, d) row.
    out = jnp.sum(h * w4_ref[...], axis=-1, keepdims=True)
    o_ref[...] = out.astype(o_ref.dtype)


def _pick_bm(B):
    # Prefer an MXU-sized batch tile (up to 256 rows) that divides B and yields
    # >= 2 grid steps (DMA/compute overlap; both v7x TensorCores busy).
    for cand in (256, 128, 64, 32, 16, 8):
        if B % cand == 0 and B // cand >= 2:
            return cand
    return B


def discriminator_forward(x, w1, w2, w3, w4, *, bm=None, use_bf16=True):
    """x: (B, in_dim); w_i: (in_i, out_i), i.e. already transposed for x @ W."""
    B, in_dim = x.shape
    d4, d2, d = w1.shape[1], w2.shape[1], w3.shape[1]
    out_dim = w4.shape[1]  # == 1

    if bm is None:
        bm = _pick_bm(B)
    assert B % bm == 0, (B, bm)
    grid = (B // bm,)

    # bf16 operands for the MXU (f32 accumulation happens in the kernel); the
    # final (d -> 1) weight stays f32 since it feeds the VPU reduction.
    mx_dtype = jnp.bfloat16 if use_bf16 else x.dtype
    xk = x.astype(mx_dtype)
    w1k, w2k, w3k = (w.astype(mx_dtype) for w in (w1, w2, w3))
    w4k = w4.reshape(1, d).astype(jnp.float32)

    def resident(shape):
        # Full-array block; block index never changes across grid steps, so
        # Pallas keeps the weight resident in VMEM instead of re-DMAing it.
        return pl.BlockSpec(shape, lambda i: (0, 0))

    def nbytes(a):
        return a.size * a.dtype.itemsize

    cost = pl.CostEstimate(
        flops=2 * B * (in_dim * d4 + d4 * d2 + d2 * d + d * out_dim),
        transcendentals=0,
        bytes_accessed=(nbytes(xk) + nbytes(w1k) + nbytes(w2k) + nbytes(w3k)
                        + nbytes(w4k) + B * out_dim * jnp.dtype(x.dtype).itemsize),
    )

    return pl.pallas_call(
        discriminator_kernel,
        out_shape=jax.ShapeDtypeStruct((B, out_dim), x.dtype),
        grid_spec=pltpu.PrefetchScalarGridSpec(
            num_scalar_prefetch=0,
            grid=grid,
            in_specs=[
                pl.BlockSpec((bm, in_dim), lambda i: (i, 0)),  # x streamed over batch
                resident(w1k.shape),
                resident(w2k.shape),
                resident(w3k.shape),
                resident(w4k.shape),
            ],
            out_specs=pl.BlockSpec((bm, out_dim), lambda i: (i, 0)),
        ),
        compiler_params=pltpu.CompilerParams(
            dimension_semantics=("parallel",),
        ),
        cost_estimate=cost,
    )(xk, w1k, w2k, w3k, w4k)


def init_discriminator_params(key, in_dim, d=64, dtype=jnp.float32):
    """Deterministic synthetic weights matching nn.Linear(in, out, bias=False);
    stored pre-transposed as (in, out) for the x @ W convention."""
    dims = [in_dim, d * 4, d * 2, d, 1]
    keys = jax.random.split(key, 4)
    weights = []
    for k, fan_in, fan_out in zip(keys, dims[:-1], dims[1:]):
        bound = 1.0 / jnp.sqrt(fan_in)
        w = jax.random.uniform(k, (fan_in, fan_out), dtype=dtype,
                               minval=-bound, maxval=bound)
        weights.append(w)
    return weights


def reference_forward(x, weights, *, use_bf16=False):
    """Pure-JAX reference. use_bf16=True mirrors the kernel's bf16-operand /
    f32-accumulate arithmetic; False is the exact f32 PyTorch semantics."""
    lk = 0.01
    mx = jnp.bfloat16 if use_bf16 else x.dtype
    h = x
    for i, w in enumerate(weights):
        if i < len(weights) - 1:
            h = jnp.dot(h.astype(mx), w.astype(mx),
                        preferred_element_type=jnp.float32)
            h = jnp.where(h > 0, h, lk * h)
        else:
            # Final layer is done in f32 in the kernel too.
            h = jnp.dot(h.astype(jnp.float32), w.astype(jnp.float32),
                        preferred_element_type=jnp.float32)
    return h


if __name__ == "__main__":
    key = jax.random.PRNGKey(0)
    k_x, k_w = jax.random.split(key)

    # Small but MXU-friendly problem: B=256 -> bm=128, grid=(2,).
    B, in_dim, d = 256, 32, 64
    x = jax.random.normal(k_x, (B, in_dim), dtype=jnp.float32)
    weights = init_discriminator_params(k_w, in_dim, d=d)

    out = discriminator_forward(x, *weights)
    out = jax.block_until_ready(out)

    ref_same_arith = reference_forward(x, weights, use_bf16=True)
    ref_f32 = reference_forward(x, weights, use_bf16=False)

    assert out.shape == (B, 1), out.shape
    assert jnp.allclose(out, ref_same_arith, atol=1e-4, rtol=1e-4), \
        "mismatch vs bf16-operand reference"
    assert jnp.allclose(out, ref_f32, atol=1e-2, rtol=1e-1), \
        "mismatch vs f32 reference"

    print("KERNEL_OK")
</pallas_src>

<mosaic_0001>
module attributes {stable_mosaic.version = 11 : i64} {
  func.func @discriminator_kernel(%arg0: i32, %arg1: memref<128x32xbf16, #tpu.memory_space<vmem>>, %arg2: memref<32x256xbf16, #tpu.memory_space<vmem>>, %arg3: memref<256x128xbf16, #tpu.memory_space<vmem>>, %arg4: memref<128x64xbf16, #tpu.memory_space<vmem>>, %arg5: memref<1x64xf32, #tpu.memory_space<vmem>>, %arg6: memref<128x1xf32, #tpu.memory_space<vmem>>) attributes {dimension_semantics = [#tpu.dimension_semantics<parallel>], iteration_bounds = array<i64: 2>, scalar_prefetch = 0 : i64, scratch_operands = 0 : i64, tpu.core_type = #tpu.core_type<tc>, window_params = [{transform_indices = @transform_0, window_bounds = array<i64: 128, 32>}, {pipeline_mode = #tpu.pipeline_mode<synchronous>, transform_indices = @transform_1, window_bounds = array<i64: 32, 256>}, {pipeline_mode = #tpu.pipeline_mode<synchronous>, transform_indices = @transform_2, window_bounds = array<i64: 256, 128>}, {pipeline_mode = #tpu.pipeline_mode<synchronous>, transform_indices = @transform_3, window_bounds = array<i64: 128, 64>}, {pipeline_mode = #tpu.pipeline_mode<synchronous>, transform_indices = @transform_4, window_bounds = array<i64: 1, 64>}, {transform_indices = @transform_5, window_bounds = array<i64: 128, 1>}]} {
    %c0 = arith.constant 0 : index
    %c0_0 = arith.constant 0 : index
    %0 = vector.load %arg1[%c0, %c0_0] : memref<128x32xbf16, #tpu.memory_space<vmem>>, vector<128x32xbf16>
    %c0_1 = arith.constant 0 : index
    %c0_2 = arith.constant 0 : index
    %1 = vector.load %arg2[%c0_1, %c0_2] : memref<32x256xbf16, #tpu.memory_space<vmem>>, vector<32x256xbf16>
    %cst = arith.constant dense<0.000000e+00> : vector<128x256xf32>
    %2 = tpu.matmul %0, %1, %cst {dimension_numbers = #tpu.dot_dimension_numbers<[1], [0], [0], [1], [0, 0, 1, 1], [], []>} : vector<128x32xbf16>, vector<32x256xbf16>, vector<128x256xf32> -> vector<128x256xf32>
    %cst_3 = arith.constant 0.000000e+00 : f32
    %3 = vector.broadcast %cst_3 : f32 to vector<128x256xf32>
    %4 = arith.cmpf ogt, %2, %3 : vector<128x256xf32>
    %cst_4 = arith.constant 0.00999999977 : f32
    %5 = vector.broadcast %cst_4 : f32 to vector<128x256xf32>
    %6 = arith.mulf %5, %2 : vector<128x256xf32>
    %7 = arith.select %4, %2, %6 : vector<128x256xi1>, vector<128x256xf32>
    %8 = arith.truncf %7 : vector<128x256xf32> to vector<128x256xbf16>
    %c0_5 = arith.constant 0 : index
    %c0_6 = arith.constant 0 : index
    %9 = vector.load %arg3[%c0_5, %c0_6] : memref<256x128xbf16, #tpu.memory_space<vmem>>, vector<256x128xbf16>
    %cst_7 = arith.constant dense<0.000000e+00> : vector<128x128xf32>
    %10 = tpu.matmul %8, %9, %cst_7 {dimension_numbers = #tpu.dot_dimension_numbers<[1], [0], [0], [1], [0, 0, 1, 1], [], []>} : vector<128x256xbf16>, vector<256x128xbf16>, vector<128x128xf32> -> vector<128x128xf32>
    %cst_8 = arith.constant 0.000000e+00 : f32
    %11 = vector.broadcast %cst_8 : f32 to vector<128x128xf32>
    %12 = arith.cmpf ogt, %10, %11 : vector<128x128xf32>
    %cst_9 = arith.constant 0.00999999977 : f32
    %13 = vector.broadcast %cst_9 : f32 to vector<128x128xf32>
    %14 = arith.mulf %13, %10 : vector<128x128xf32>
    %15 = arith.select %12, %10, %14 : vector<128x128xi1>, vector<128x128xf32>
    %16 = arith.truncf %15 : vector<128x128xf32> to vector<128x128xbf16>
    %c0_10 = arith.constant 0 : index
    %c0_11 = arith.constant 0 : index
    %17 = vector.load %arg4[%c0_10, %c0_11] : memref<128x64xbf16, #tpu.memory_space<vmem>>, vector<128x64xbf16>
    %cst_12 = arith.constant dense<0.000000e+00> : vector<128x64xf32>
    %18 = tpu.matmul %16, %17, %cst_12 {dimension_numbers = #tpu.dot_dimension_numbers<[1], [0], [0], [1], [0, 0, 1, 1], [], []>} : vector<128x128xbf16>, vector<128x64xbf16>, vector<128x64xf32> -> vector<128x64xf32>
    %cst_13 = arith.constant 0.000000e+00 : f32
    %19 = vector.broadcast %cst_13 : f32 to vector<128x64xf32>
    %20 = arith.cmpf ogt, %18, %19 : vector<128x64xf32>
    %cst_14 = arith.constant 0.00999999977 : f32
    %21 = vector.broadcast %cst_14 : f32 to vector<128x64xf32>
    %22 = arith.mulf %21, %18 : vector<128x64xf32>
    %23 = arith.select %20, %18, %22 : vector<128x64xi1>, vector<128x64xf32>
    %c0_15 = arith.constant 0 : index
    %c0_16 = arith.constant 0 : index
    %24 = vector.load %arg5[%c0_15, %c0_16] : memref<1x64xf32, #tpu.memory_space<vmem>>, vector<1x64xf32>
    %25 = vector.broadcast %24 : vector<1x64xf32> to vector<128x64xf32>
    %26 = arith.mulf %23, %25 : vector<128x64xf32>
    %cst_17 = arith.constant dense<0.000000e+00> : vector<128xf32>
    %27 = vector.multi_reduction <add>, %26, %cst_17 [1] : vector<128x64xf32> to vector<128xf32>
    %28 = vector.shape_cast %27 : vector<128xf32> to vector<128x1xf32>
    %c0_18 = arith.constant 0 : index
    %c0_19 = arith.constant 0 : index
    %29 = vector.load %arg6[%c0_18, %c0_19] : memref<128x1xf32, #tpu.memory_space<vmem>>, vector<128x1xf32>
    tpu.vector_store %arg6[%c0_18, %c0_19], %28 {strides = array<i32>} : memref<128x1xf32, #tpu.memory_space<vmem>>, vector<128x1xf32>,
    return
  }
  func.func @transform_0(%arg0: i32) -> (i32, i32) {
    %c0_i32 = arith.constant 0 : i32
    %c0_i32_0 = arith.constant 0 : i32
    return %arg0, %c0_i32 : i32, i32
  }
  func.func @transform_1(%arg0: i32) -> (i32, i32) {
    %c0_i32 = arith.constant 0 : i32
    %c0_i32_0 = arith.constant 0 : i32
    %c0_i32_1 = arith.constant 0 : i32
    return %c0_i32, %c0_i32_0 : i32, i32
  }
  func.func @transform_2(%arg0: i32) -> (i32, i32) {
    %c0_i32 = arith.constant 0 : i32
    %c0_i32_0 = arith.constant 0 : i32
    %c0_i32_1 = arith.constant 0 : i32
    return %c0_i32, %c0_i32_0 : i32, i32
  }
  func.func @transform_3(%arg0: i32) -> (i32, i32) {
    %c0_i32 = arith.constant 0 : i32
    %c0_i32_0 = arith.constant 0 : i32
    %c0_i32_1 = arith.constant 0 : i32
    return %c0_i32, %c0_i32_0 : i32, i32
  }
  func.func @transform_4(%arg0: i32) -> (i32, i32) {
    %c0_i32 = arith.constant 0 : i32
    %c0_i32_0 = arith.constant 0 : i32
    %c0_i32_1 = arith.constant 0 : i32
    return %c0_i32, %c0_i32_0 : i32, i32
  }
  func.func @transform_5(%arg0: i32) -> (i32, i32) {
    %c0_i32 = arith.constant 0 : i32
    %c0_i32_0 = arith.constant 0 : i32
    return %arg0, %c0_i32 : i32, i32
  }
}

</mosaic_0001>

<bundles_post_ra>
// kernel: tpu_custom_call.1
= control target key start
LH: loop header
LB: loop body
LE: loop exit
PB: predicated region body
PF: predicated region fallthrough
CT: control target
= control target key end

     0   :  { %s1448_s18 = smov 0   ;;  %s1642_s0 = inlined_call_operand.vmem [shape: bf16[256,32], index: 0, kind: input, shape index: {}]   ;;  %s1643_s1 = inlined_call_operand.vmem [shape: bf16[32,256], index: 1, kind: input, shape index: {}]   ;;  %s1644_s2 = inlined_call_operand.vmem [shape: bf16[256,128], index: 2, kind: input, shape index: {}]   ;;  %s1645_s3 = inlined_call_operand.vmem [shape: bf16[128,64], index: 3, kind: input, shape index: {}]   ;;  %s1646_s4 = inlined_call_operand.vmem [shape: f32[1,64], index: 4, kind: input, shape index: {}]   ;;  %s1647_s5 = inlined_call_operand.vmem [shape: f32[256,1], index: 5, kind: output, shape index: {}]  }
   0x1 LB: > { %s1194_s19 = sadd.s32 4294967295, %s1415_s18   ;;  %p1198_p0 = scmp.ge.s32.totalorder %s1415_s18, 1  ;;  %s1415_s18 = sphi %s1448_s18, %s15_s18  }
   0x2   : > { %p188_p1 = scmp.lt.s32.totalorder %s1415_s18, 3 }
   0x4   : > { %p189_p2 = pnand %p1198_p0, %p188_p1 }
   0x5   : > { %s1199_s22 = sshll.u32 (!%p189_p2), %s1194_s19, 4 }
   0x6   : > { %192 = sbr.rel (%p189_p2) target bundleno = 835 (0x343), region = 40  ;;  %p217_p3 = scmp.lt.s32.totalorder (!%p189_p2), %s1199_s22, 31 }
   0xb   : > { %v1371_v0 = vld [vmem:[%s1643_s1 + $0x14] ss:$8 sps:$4 sm:$0xff]   ;;  %v1373_v1 = vld [vmem:[%s1643_s1 + $0x10] ss:$8 sps:$4 sm:$0xff]   ;;  %v1417_v2 = vmov 0   ;;  %s1649_s22 = smov (!%p217_p3, %s1199_s22), 31 }
   0xc   : > { %366 = vmatprep.mubr.bf16.mxu0 %v1417_v2  ;;  %346 = vmatprep.subr.bf16.mxu0 %v1371_v0  ;;  %v1374_v3 = vld [vmem:[%s1643_s1 + $0x4] ss:$8 sps:$4 sm:$0xff]   ;;  %v1376_v4 = vld [vmem:[%s1643_s1] ss:$8 sps:$4 sm:$0xff]   ;;  %v1385_v5 = vld [vmem:[%s1644_s2 + $0x78] sm:$0xff]   ;;  %s1200_s8 = sshll.u32 %s1649_s22, 2 }
   0xd   : > { %347 = vmatpush1.bf16.msra.mxu0 %v1373_v1  ;;  %v1386_v6 = vld [vmem:[%s1644_s2 + $0x38] sm:$0xff]   ;;  %1250 = vmatprep.subr.bf16.mxu1 %v1385_v5  ;;  %v1387_v7 = vld [vmem:[%s1644_s2 + $0x70] sm:$0xff]   ;;  %s1483_s13 = scalar_lea.vmem %s1642_s0, %s1200_s8  ;;  %vm309_vm0 = vcmask 261120   ;;  %v1389_v11 = vld [vmem:[%s1644_s2 + $0x68] sm:$0xff]   ;;  %s1202_s12 = sshll.u32 %s1649_s22, 3 }
   0xe   : > { %348 = vmatprep.subr.bf16.mxu0 %v1374_v3  ;;  %1251 = vmatpush3.bf16.msra.mxu1 %v1386_v6  ;;  %v1388_v8 = vld [vmem:[%s1644_s2 + $0x30] sm:$0xff]   ;;  %v1377_v9 = vld [vmem:[%s1483_s13] sm:$0xff]   ;;  %v1378_v10 = vld [vmem:[%s1483_s13 + $0x8] sm:$0xff]   ;;  %s1605_s15 = scalar_lea.vmem %s1647_s5, %s1202_s12 }
   0xf   : > { %1252 = vmatprep.subr.bf16.mxu1 %v1387_v7  ;;  %v1390_v12 = vld [vmem:[%s1644_s2 + $0x28] sm:$0xff]   ;;  %v1391_v13 = vld [vmem:[%s1644_s2 + $0x60] sm:$0xff]   ;;  %v1393_v15 = vld [vmem:[%s1644_s2 + $0x58] sm:$0xff]  }
  0x10   : > { %v1392_v14 = vld [vmem:[%s1644_s2 + $0x20] sm:$0xff]   ;;  %v1379_v16 = vld [vmem:[%s1483_s13 + $0x10] sm:$0xff]   ;;  %v1394_v17 = vld [vmem:[%s1644_s2 + $0x18] sm:$0xff]  }
  0x11   : > { %349 = vmatpush1.bf16.msra.mxu0 %v1376_v4  ;;  %v1380_v18 = vld [vmem:[%s1483_s13 + $0x18] sm:$0xff]   ;;  %v1381_v19 = vld [vmem:[%s1483_s13 + $0x20] sm:$0xff]   ;;  %v1382_v20 = vld [vmem:[%s1483_s13 + $0x28] sm:$0xff]  }
  0x12   : > { %1253 = vmatpush3.bf16.msra.mxu1 %v1388_v8  ;;  %v1383_v21 = vld [vmem:[%s1483_s13 + $0x30] sm:$0xff]   ;;  %v1384_v22 = vld [vmem:[%s1483_s13 + $0x38] sm:$0xff]   ;;  %v1397_v25 = vld [vmem:[%s1644_s2 + $0x48] sm:$0xff]  }
  0x13   : > { %1254 = vmatprep.subr.bf16.mxu1 %v1389_v11  ;;  %v1395_v23 = vld [vmem:[%s1644_s2 + $0x50] sm:$0xff]   ;;  %v1398_v26 = vld [vmem:[%s1644_s2 + $0x8] sm:$0xff]   ;;  %v1399_v27 = vld [vmem:[%s1644_s2 + $0x40] sm:$0xff]  }
  0x14   : > { %1215 = vmatmul.mubr.msk.bf16.vlgmr.msra.gmra.mxu0 %vm309_vm0, %v1377_v9  ;;  %v1396_v24 = vld [vmem:[%s1644_s2 + $0x10] sm:$0xff]   ;;  %v1400_v28 = vld [vmem:[%s1644_s2] sm:$0xff]   ;;  %v1401_v29 = vld [vmem:[%s1645_s3 + $0x38] sm:$0xff]  }
  0x15   : > { %376 = vmatprep.mubr.bf16.mxu0 %v1417_v2  ;;  %v1402_v30 = vld [vmem:[%s1645_s3 + $0x30] sm:$0xff]   ;;  %1330 = vmatprep.subr.bf16.mxu0 %v1401_v29  ;;  %v1403_v31 = vld [vmem:[%s1645_s3 + $0x28] sm:$0xff]  }
  0x16   : > { %1255 = vmatpush3.bf16.msra.mxu1 %v1390_v12  ;;  %1331 = vmatpush3.bf16.msra.mxu0 %v1401_v29 }
  0x17   : > { %1256 = vmatprep.subr.bf16.mxu1 %v1391_v13  ;;  %1332 = vmatprep.subr.bf16.mxu0 %v1402_v30 }
  0x1a   : > { %1257 = vmatpush3.bf16.msra.mxu1 %v1392_v14  ;;  %1333 = vmatpush3.bf16.msra.mxu0 %v1402_v30 }
  0x1b   : > { %1258 = vmatprep.subr.bf16.mxu1 %v1393_v15  ;;  %1334 = vmatprep.subr.bf16.mxu0 %v1403_v31 }
  0x1c   : > { %1216 = vmatmul.mubr.msk.bf16.gmra.mxu0 %vm309_vm0, %v1378_v10 }
  0x1d   : > { %386 = vmatprep.mubr.bf16.mxu0 %v1417_v2 }
  0x1e   : > { %1259 = vmatpush3.bf16.msra.mxu1 %v1394_v17  ;;  %1335 = vmatpush3.bf16.msra.mxu0 %v1403_v31 }
  0x1f   : > { %1260 = vmatprep.subr.bf16.mxu1 %v1395_v23 }
  0x22   : > { %1261 = vmatpush3.bf16.msra.mxu1 %v1396_v24 }
  0x23   : > { %1262 = vmatprep.subr.bf16.mxu1 %v1397_v25 }
  0x24   : > { %1217 = vmatmul.mubr.msk.bf16.gmra.mxu0 %vm309_vm0, %v1379_v16 }
  0x25   : > { %396 = vmatprep.mubr.bf16.mxu0 %v1417_v2 }
  0x26   : > { %1263 = vmatpush3.bf16.msra.mxu1 %v1398_v26 }
  0x27   : > { %1264 = vmatprep.subr.bf16.mxu1 %v1399_v27 }
  0x2a   : > { %1265 = vmatpush3.bf16.msra.mxu1 %v1400_v28 }
  0x2c   : > { %1218 = vmatmul.mubr.msk.bf16.gmra.mxu0 %vm309_vm0, %v1380_v18 }
  0x2d   : > { %406 = vmatprep.mubr.bf16.mxu0 %v1417_v2 }
  0x34   : > { %1219 = vmatmul.mubr.msk.bf16.gmra.mxu0 %vm309_vm0, %v1381_v19 }
  0x35   : > { %416 = vmatprep.mubr.bf16.mxu0 %v1417_v2 }
  0x3c   : > { %1220 = vmatmul.mubr.msk.bf16.gmra.mxu0 %vm309_vm0, %v1382_v20 }
  0x3d   : > { %426 = vmatprep.mubr.bf16.mxu0 %v1417_v2 }
  0x44   : > { %1221 = vmatmul.mubr.msk.bf16.gmra.mxu0 %vm309_vm0, %v1383_v21 }
  0x45   : > { %436 = vmatprep.mubr.bf16.mxu0 %v1417_v2 }
  0x4c   : > { %1222 = vmatmul.mubr.msk.bf16.gmra.mxu0 %vm309_vm0, %v1384_v22 }
  0xd4   : > { %v368_v32 = vpop.f32.mrf.mxu0 }
  0xd5   : > { %v479_v37 = vmul.f32 0.01, %v368_v32  ;;  %vm447_vm3 = vcmp.gt.f32.partialorder %v368_v32, 0.0 }
  0xd6   : > { %v370_v33 = vpop.f32.mrf.mxu0 }
  0xd7   : > { %v480_v35 = vmul.f32 0.01, %v370_v33  ;;  %vm448_vm2 = vcmp.gt.f32.partialorder %v370_v33, 0.0  ;;  %v511_v44 = vsel %vm447_vm3, %v368_v32, %v479_v37 }
  0xd8   : > { %v372_v34 = vpop.f32.mrf.mxu0 }
  0xd9   : > { %vm449_vm1 = vcmp.gt.f32.partialorder %v372_v34, 0.0  ;;  %v481_v36 = vmul.f32 0.01, %v372_v34  ;;  %v512_v42 = vsel %vm448_vm2, %v370_v33, %v480_v35 }
  0xda   : > { %v374_v38 = vpop.f32.mrf.mxu0 }
  0xdb   : > { %v482_v39 = vmul.f32 0.01, %v374_v38  ;;  %vm450_vm4 = vcmp.gt.f32.partialorder %v374_v38, 0.0  ;;  %v513_v40 = vsel %vm449_vm1, %v372_v34, %v481_v36 }
  0xdc   : > { %v378_v41 = vpop.f32.mrf.mxu0  ;;  %v543_v47 = vpack.c.bf16 %v513_v40, %v511_v44 }
  0xdd   : > { %v514_v43 = vsel %vm450_vm4, %v374_v38, %v482_v39  ;;  %v483_v51 = vmul.f32 0.01, %v378_v41  ;;  %vm451_vm7 = vcmp.gt.f32.partialorder %v378_v41, 0.0 }
  0xde   : > { %v380_v45 = vpop.f32.mrf.mxu0  ;;  %v544_v46 = vpack.c.bf16 %v514_v43, %v512_v42 }
  0xdf   : > { %v484_v49 = vmul.f32 0.01, %v380_v45  ;;  %vm452_vm6 = vcmp.gt.f32.partialorder %v380_v45, 0.0  ;;  %v515_v58 = vsel %vm451_vm7, %v378_v41, %v483_v51 }
  0xe0   : > { %v382_v48 = vpop.f32.mrf.mxu0  ;;  %719 = vmatprep.mubr.bf16.mxu1 %v544_v46 }
  0xe1   : > { %vm453_vm5 = vcmp.gt.f32.partialorder %v382_v48, 0.0  ;;  %v485_v50 = vmul.f32 0.01, %v382_v48  ;;  %720 = vmatmul.mubr.bf16.vlgmr.msra.gmra.mxu1 %v543_v47  ;;  %v516_v56 = vsel %vm452_vm6, %v380_v45, %v484_v49 }
  0xe2   : > { %v384_v52 = vpop.f32.mrf.mxu0 }
  0xe3   : > { %vm454_vm8 = vcmp.gt.f32.partialorder %v384_v52, 0.0  ;;  %v486_v53 = vmul.f32 0.01, %v384_v52  ;;  %v517_v54 = vsel %vm453_vm5, %v382_v48, %v485_v50 }
  0xe4   : > { %v388_v55 = vpop.f32.mrf.mxu0  ;;  %v545_v61 = vpack.c.bf16 %v517_v54, %v515_v58 }
  0xe5   : > { %v518_v57 = vsel %vm454_vm8, %v384_v52, %v486_v53  ;;  %v487_v1 = vmul.f32 0.01, %v388_v55  ;;  %vm455_vm11 = vcmp.gt.f32.partialorder %v388_v55, 0.0 }
  0xe6   : > { %v390_v59 = vpop.f32.mrf.mxu0  ;;  %v546_v60 = vpack.c.bf16 %v518_v57, %v516_v56 }
  0xe7   : > { %v488_v63 = vmul.f32 0.01, %v390_v59  ;;  %vm456_vm10 = vcmp.gt.f32.partialorder %v390_v59, 0.0  ;;  %v519_v8 = vsel %vm455_vm11, %v388_v55, %v487_v1 }
  0xe8   : > { %v392_v62 = vpop.f32.mrf.mxu0  ;;  %727 = vmatprep.mubr.bf16.mxu1 %v546_v60 }
  0xe9   : > { %vm457_vm9 = vcmp.gt.f32.partialorder %v392_v62, 0.0  ;;  %v489_v0 = vmul.f32 0.01, %v392_v62  ;;  %728 = vmatmul.mubr.bf16.gmra.mxu1 %v545_v61  ;;  %v520_v6 = vsel %vm456_vm10, %v390_v59, %v488_v63 }
  0xea   : > { %v394_v2 = vpop.f32.mrf.mxu0 }
  0xeb   : > { %vm458_vm12 = vcmp.gt.f32.partialorder %v394_v2, 0.0  ;;  %v490_v3 = vmul.f32 0.01, %v394_v2  ;;  %v521_v4 = vsel %vm457_vm9, %v392_v62, %v489_v0 }
  0xec   : > { %v398_v5 = vpop.f32.mrf.mxu0  ;;  %v547_v11 = vpack.c.bf16 %v521_v4, %v519_v8 }
  0xed   : > { %v522_v7 = vsel %vm458_vm12, %v394_v2, %v490_v3  ;;  %v491_v15 = vmul.f32 0.01, %v398_v5  ;;  %vm459_vm15 = vcmp.gt.f32.partialorder %v398_v5, 0.0 }
  0xee   : > { %v400_v9 = vpop.f32.mrf.mxu0  ;;  %v548_v10 = vpack.c.bf16 %v522_v7, %v520_v6 }
  0xef   : > { %v492_v13 = vmul.f32 0.01, %v400_v9  ;;  %vm460_vm14 = vcmp.gt.f32.partialorder %v400_v9, 0.0  ;;  %v523_v22 = vsel %vm459_vm15, %v398_v5, %v491_v15 }
  0xf0   : > { %v402_v12 = vpop.f32.mrf.mxu0  ;;  %735 = vmatprep.mubr.bf16.mxu1 %v548_v10 }
  0xf1   : > { %vm461_vm13 = vcmp.gt.f32.partialorder %v402_v12, 0.0  ;;  %v493_v14 = vmul.f32 0.01, %v402_v12  ;;  %736 = vmatmul.mubr.bf16.gmra.mxu1 %v547_v11  ;;  %v524_v20 = vsel %vm460_vm14, %v400_v9, %v492_v13 }
  0xf2   : > { %v404_v16 = vpop.f32.mrf.mxu0 }
  0xf3   : > { %vm462_vm0 = vcmp.gt.f32.partialorder %v404_v16, 0.0  ;;  %v494_v17 = vmul.f32 0.01, %v404_v16  ;;  %v525_v18 = vsel %vm461_vm13, %v402_v12, %v493_v14 }
  0xf4   : > { %v408_v19 = vpop.f32.mrf.mxu0  ;;  %v549_v25 = vpack.c.bf16 %v525_v18, %v523_v22  ;;  %v1406_v18 = vld [vmem:[%s1645_s3 + $0x10] sm:$0xff]  }
  0xf5   : > { %v526_v21 = vsel %vm462_vm0, %v404_v16, %v494_v17  ;;  %v495_v29 = vmul.f32 0.01, %v408_v19  ;;  %vm463_vm3 = vcmp.gt.f32.partialorder %v408_v19, 0.0  ;;  %v1404_v16 = vld [vmem:[%s1645_s3 + $0x20] sm:$0xff]   ;;  %v1405_v17 = vld [vmem:[%s1645_s3 + $0x18] sm:$0xff]  }
  0xf6   : > { %v410_v23 = vpop.f32.mrf.mxu0  ;;  %v550_v24 = vpack.c.bf16 %v526_v21, %v524_v20  ;;  %1336 = vmatprep.subr.bf16.mxu0 %v1404_v16  ;;  %v1408_v20 = vld [vmem:[%s1645_s3] sm:$0xff]  }
  0xf7   : > { %v496_v27 = vmul.f32 0.01, %v410_v23  ;;  %vm464_vm2 = vcmp.gt.f32.partialorder %v410_v23, 0.0  ;;  %v527_v36 = vsel %vm463_vm3, %v408_v19, %v495_v29  ;;  %1337 = vmatpush3.bf16.msra.mxu0 %v1404_v16  ;;  %v1407_v19 = vld [vmem:[%s1645_s3 + $0x8] sm:$0xff]  }
  0xf8   : > { %v412_v26 = vpop.f32.mrf.mxu0  ;;  %743 = vmatprep.mubr.bf16.mxu1 %v550_v24  ;;  %1338 = vmatprep.subr.bf16.mxu0 %v1405_v17 }
  0xf9   : > { %vm465_vm1 = vcmp.gt.f32.partialorder %v412_v26, 0.0  ;;  %v497_v28 = vmul.f32 0.01, %v412_v26  ;;  %744 = vmatmul.mubr.bf16.gmra.mxu1 %v549_v25  ;;  %v528_v34 = vsel %vm464_vm2, %v410_v23, %v496_v27 }
  0xfa   : > { %v414_v30 = vpop.f32.mrf.mxu0 }
  0xfb   : > { %vm466_vm4 = vcmp.gt.f32.partialorder %v414_v30, 0.0  ;;  %v498_v31 = vmul.f32 0.01, %v414_v30  ;;  %v529_v32 = vsel %vm465_vm1, %v412_v26, %v497_v28  ;;  %1339 = vmatpush3.bf16.msra.mxu0 %v1405_v17 }
  0xfc   : > { %v418_v33 = vpop.f32.mrf.mxu0  ;;  %v551_v39 = vpack.c.bf16 %v529_v32, %v527_v36  ;;  %1340 = vmatprep.subr.bf16.mxu0 %v1406_v18 }
  0xfd   : > { %v530_v35 = vsel %vm466_vm4, %v414_v30, %v498_v31  ;;  %v499_v43 = vmul.f32 0.01, %v418_v33  ;;  %vm467_vm7 = vcmp.gt.f32.partialorder %v418_v33, 0.0 }
  0xfe   : > { %v420_v37 = vpop.f32.mrf.mxu0  ;;  %v552_v38 = vpack.c.bf16 %v530_v35, %v528_v34 }
  0xff   : > { %v500_v41 = vmul.f32 0.01, %v420_v37  ;;  %vm468_vm6 = vcmp.gt.f32.partialorder %v420_v37, 0.0  ;;  %v531_v50 = vsel %vm467_vm7, %v418_v33, %v499_v43  ;;  %1341 = vmatpush3.bf16.msra.mxu0 %v1406_v18 }
 0x100   : > { %v422_v40 = vpop.f32.mrf.mxu0  ;;  %751 = vmatprep.mubr.bf16.mxu1 %v552_v38  ;;  %1342 = vmatprep.subr.bf16.mxu0 %v1407_v19 }
 0x101   : > { %vm469_vm5 = vcmp.gt.f32.partialorder %v422_v40, 0.0  ;;  %v501_v42 = vmul.f32 0.01, %v422_v40  ;;  %752 = vmatmul.mubr.bf16.gmra.mxu1 %v551_v39  ;;  %v532_v48 = vsel %vm468_vm6, %v420_v37, %v500_v41 }
 0x102   : > { %v424_v44 = vpop.f32.mrf.mxu0 }
 0x103   : > { %vm470_vm8 = vcmp.gt.f32.partialorder %v424_v44, 0.0  ;;  %v502_v45 = vmul.f32 0.01, %v424_v44  ;;  %v533_v46 = vsel %vm469_vm5, %v422_v40, %v501_v42  ;;  %1343 = vmatpush3.bf16.msra.mxu0 %v1407_v19 }
 0x104   : > { %v428_v47 = vpop.f32.mrf.mxu0  ;;  %v553_v53 = vpack.c.bf16 %v533_v46, %v531_v50  ;;  %1344 = vmatprep.subr.bf16.mxu0 %v1408_v20 }
 0x105   : > { %v534_v49 = vsel %vm470_vm8, %v424_v44, %v502_v45  ;;  %v503_v57 = vmul.f32 0.01, %v428_v47  ;;  %vm471_vm11 = vcmp.gt.f32.partialorder %v428_v47, 0.0 }
 0x106   : > { %v430_v51 = vpop.f32.mrf.mxu0  ;;  %v554_v52 = vpack.c.bf16 %v534_v49, %v532_v48 }
 0x107   : > { %v504_v55 = vmul.f32 0.01, %v430_v51  ;;  %vm472_vm10 = vcmp.gt.f32.partialorder %v430_v51, 0.0  ;;  %v535_v0 = vsel %vm471_vm11, %v428_v47, %v503_v57  ;;  %1345 = vmatpush3.bf16.msra.mxu0 %v1408_v20 }
 0x108   : > { %v432_v54 = vpop.f32.mrf.mxu0  ;;  %759 = vmatprep.mubr.bf16.mxu1 %v554_v52 }
 0x109   : > { %vm473_vm9 = vcmp.gt.f32.partialorder %v432_v54, 0.0  ;;  %v505_v56 = vmul.f32 0.01, %v432_v54  ;;  %760 = vmatmul.mubr.bf16.gmra.mxu1 %v553_v53  ;;  %v536_v62 = vsel %vm472_vm10, %v430_v51, %v504_v55 }
 0x10a   : > { %v434_v58 = vpop.f32.mrf.mxu0 }
 0x10b   : > { %vm474_vm12 = vcmp.gt.f32.partialorder %v434_v58, 0.0  ;;  %v506_v59 = vmul.f32 0.01, %v434_v58  ;;  %v537_v60 = vsel %vm473_vm9, %v432_v54, %v505_v56 }
 0x10c   : > { %v438_v61 = vpop.f32.mrf.mxu0  ;;  %v555_v3 = vpack.c.bf16 %v537_v60, %v535_v0 }
 0x10d   : > { %v538_v63 = vsel %vm474_vm12, %v434_v58, %v506_v59  ;;  %v507_v7 = vmul.f32 0.01, %v438_v61  ;;  %vm475_vm15 = vcmp.gt.f32.partialorder %v438_v61, 0.0 }
 0x10e   : > { %v440_v1 = vpop.f32.mrf.mxu0  ;;  %v556_v2 = vpack.c.bf16 %v538_v63, %v536_v62 }
 0x10f   : > { %v508_v5 = vmul.f32 0.01, %v440_v1  ;;  %vm476_vm14 = vcmp.gt.f32.partialorder %v440_v1, 0.0  ;;  %v539_v13 = vsel %vm475_vm15, %v438_v61, %v507_v7 }
 0x110   : > { %v442_v4 = vpop.f32.mrf.mxu0  ;;  %767 = vmatprep.mubr.bf16.mxu1 %v556_v2 }
 0x111   : > { %vm477_vm13 = vcmp.gt.f32.partialorder %v442_v4, 0.0  ;;  %v509_v6 = vmul.f32 0.01, %v442_v4  ;;  %768 = vmatmul.mubr.bf16.gmra.mxu1 %v555_v3  ;;  %v540_v11 = vsel %vm476_vm14, %v440_v1, %v508_v5 }
 0x112   : > { %v444_v8 = vpop.f32.mrf.mxu0 }
 0x113   : > { %vm478_vm0 = vcmp.gt.f32.partialorder %v444_v8, 0.0  ;;  %v510_v9 = vmul.f32 0.01, %v444_v8  ;;  %v541_v10 = vsel %vm477_vm13, %v442_v4, %v509_v6 }
 0x114   : > { %v557_v15 = vpack.c.bf16 %v541_v10, %v539_v13 }
 0x115   : > { %v542_v12 = vsel %vm478_vm0, %v444_v8, %v510_v9 }
 0x116   : > { %v558_v14 = vpack.c.bf16 %v542_v12, %v540_v11 }
 0x118   : > { %775 = vmatprep.mubr.bf16.mxu1 %v558_v14 }
 0x119   : > { %776 = vmatmul.mubr.bf16.gmra.mxu1 %v557_v15 }
 0x1a1   : > { %v1266_v21 = vpop.f32.mrf.mxu1 }
 0x1a3   : > { %v1267_v22 = vpop.f32.mrf.mxu1 }
 0x1a4   : > { %v1268_v23 = vadd.f32 %v1267_v22, %v1266_v21 }
 0x1a5   : > { %v1269_v24 = vpop.f32.mrf.mxu1 }
 0x1a6   : > { %v800_v26 = vmul.f32 0.01, %v1268_v23  ;;  %vm784_vm1 = vcmp.gt.f32.partialorder %v1268_v23, 0.0 }
 0x1a7   : > { %v1270_v25 = vpop.f32.mrf.mxu1 }
 0x1a8   : > { %v1271_v27 = vadd.f32 %v1270_v25, %v1269_v24  ;;  %v816_v32 = vsel %vm784_vm1, %v1268_v23, %v800_v26 }
 0x1a9   : > { %v1272_v28 = vpop.f32.mrf.mxu1 }
 0x1aa   : > { %vm785_vm2 = vcmp.gt.f32.partialorder %v1271_v27, 0.0  ;;  %v801_v29 = vmul.f32 0.01, %v1271_v27 }
 0x1ab   : > { %v1273_v30 = vpop.f32.mrf.mxu1 }
 0x1ac   : > { %v1274_v31 = vadd.f32 %v1273_v30, %v1272_v28  ;;  %v817_v33 = vsel %vm785_vm2, %v1271_v27, %v801_v29 }
 0x1ad   : > { %v1275_v34 = vpop.f32.mrf.mxu1  ;;  %v832_v35 = vpack.c.bf16 %v817_v33, %v816_v32 }
 0x1ae   : > { %v802_v37 = vmul.f32 0.01, %v1274_v31  ;;  %vm786_vm3 = vcmp.gt.f32.partialorder %v1274_v31, 0.0 }
 0x1af   : > { %v1276_v36 = vpop.f32.mrf.mxu1  ;;  %1346 = vmatprep.mubr.bf16.mxu0 %v832_v35 }
 0x1b0   : > { %v1277_v38 = vadd.f32 %v1276_v36, %v1275_v34  ;;  %v818_v42 = vsel %vm786_vm3, %v1274_v31, %v802_v37  ;;  %vm1072_vm3 = vcmask 523264  }
 0x1b1   : > { %v1278_v39 = vpop.f32.mrf.mxu1 }
 0x1b2   : > { %vm787_vm4 = vcmp.gt.f32.partialorder %v1277_v38, 0.0  ;;  %v803_v40 = vmul.f32 0.01, %v1277_v38 }
 0x1b3   : > { %v1279_v41 = vpop.f32.mrf.mxu1 }
 0x1b4   : > { %v819_v43 = vsel %vm787_vm4, %v1277_v38, %v803_v40  ;;  %v1280_v44 = vadd.f32 %v1279_v41, %v1278_v39 }
 0x1b5   : > { %v833_v45 = vpack.c.bf16 %v819_v43, %v818_v42  ;;  %v1281_v46 = vpop.f32.mrf.mxu1 }
 0x1b6   : > { %v804_v48 = vmul.f32 0.01, %v1280_v44  ;;  %vm788_vm5 = vcmp.gt.f32.partialorder %v1280_v44, 0.0 }
 0x1b7   : > { %v1282_v47 = vpop.f32.mrf.mxu1  ;;  %1347 = vmatmul.mubr.bf16.vlgmr.msra.gmra.mxu0 %v833_v45 }
 0x1b8   : > { %v1283_v49 = vadd.f32 %v1282_v47, %v1281_v46  ;;  %v820_v54 = vsel %vm788_vm5, %v1280_v44, %v804_v48  ;;  %v1567_v47 = vld [vmem:[%s1646_s4] ss:$0 sm:$0xff] }
 0x1b9   : > { %v1284_v50 = vpop.f32.mrf.mxu1 }
 0x1ba   : > { %vm789_vm6 = vcmp.gt.f32.partialorder %v1283_v49, 0.0  ;;  %v805_v51 = vmul.f32 0.01, %v1283_v49 }
 0x1bb   : > { %v1285_v52 = vpop.f32.mrf.mxu1 }
 0x1bc   : > { %v1286_v53 = vadd.f32 %v1285_v52, %v1284_v50  ;;  %v821_v55 = vsel %vm789_vm6, %v1283_v49, %v805_v51 }
 0x1bd   : > { %v1287_v56 = vpop.f32.mrf.mxu1  ;;  %v834_v57 = vpack.c.bf16 %v821_v55, %v820_v54 }
 0x1be   : > { %v806_v59 = vmul.f32 0.01, %v1286_v53  ;;  %vm790_vm7 = vcmp.gt.f32.partialorder %v1286_v53, 0.0 }
 0x1bf   : > { %v1288_v58 = vpop.f32.mrf.mxu1  ;;  %1350 = vmatprep.mubr.bf16.mxu0 %v834_v57 }
 0x1c0   : > { %v1289_v60 = vadd.f32 %v1288_v58, %v1287_v56  ;;  %v822_v1 = vsel %vm790_vm7, %v1286_v53, %v806_v59 }
 0x1c1   : > { %v1290_v61 = vpop.f32.mrf.mxu1 }
 0x1c2   : > { %vm791_vm8 = vcmp.gt.f32.partialorder %v1289_v60, 0.0  ;;  %v807_v62 = vmul.f32 0.01, %v1289_v60 }
 0x1c3   : > { %v1291_v63 = vpop.f32.mrf.mxu1 }
 0x1c4   : > { %v1292_v0 = vadd.f32 %v1291_v63, %v1290_v61  ;;  %v823_v2 = vsel %vm791_vm8, %v1289_v60, %v807_v62 }
 0x1c5   : > { %v1293_v3 = vpop.f32.mrf.mxu1  ;;  %v835_v4 = vpack.c.bf16 %v823_v2, %v822_v1 }
 0x1c6   : > { %v808_v6 = vmul.f32 0.01, %v1292_v0  ;;  %vm792_vm9 = vcmp.gt.f32.partialorder %v1292_v0, 0.0 }
 0x1c7   : > { %v1294_v5 = vpop.f32.mrf.mxu1  ;;  %1351 = vmatmul.mubr.bf16.gmra.mxu0 %v835_v4 }
 0x1c8   : > { %v1295_v7 = vadd.f32 %v1294_v5, %v1293_v3  ;;  %v824_v12 = vsel %vm792_vm9, %v1292_v0, %v808_v6 }
 0x1c9   : > { %v1296_v8 = vpop.f32.mrf.mxu1 }
 0x1ca   : > { %vm793_vm10 = vcmp.gt.f32.partialorder %v1295_v7, 0.0  ;;  %v809_v9 = vmul.f32 0.01, %v1295_v7 }
 0x1cb   : > { %v1297_v10 = vpop.f32.mrf.mxu1 }
 0x1cc   : > { %v1298_v11 = vadd.f32 %v1297_v10, %v1296_v8  ;;  %v825_v13 = vsel %vm793_vm10, %v1295_v7, %v809_v9 }
 0x1cd   : > { %v1299_v14 = vpop.f32.mrf.mxu1  ;;  %v836_v15 = vpack.c.bf16 %v825_v13, %v824_v12 }
 0x1ce   : > { %v810_v17 = vmul.f32 0.01, %v1298_v11  ;;  %vm794_vm11 = vcmp.gt.f32.partialorder %v1298_v11, 0.0 }
 0x1cf   : > { %v1300_v16 = vpop.f32.mrf.mxu1  ;;  %1354 = vmatprep.mubr.bf16.mxu0 %v836_v15 }
 0x1d0   : > { %v1301_v18 = vadd.f32 %v1300_v16, %v1299_v14  ;;  %v826_v23 = vsel %vm794_vm11, %v1298_v11, %v810_v17 }
 0x1d1   : > { %v1302_v19 = vpop.f32.mrf.mxu1 }
 0x1d2   : > { %vm795_vm12 = vcmp.gt.f32.partialorder %v1301_v18, 0.0  ;;  %v811_v20 = vmul.f32 0.01, %v1301_v18 }
 0x1d3   : > { %v1303_v21 = vpop.f32.mrf.mxu1 }
 0x1d4   : > { %v1304_v22 = vadd.f32 %v1303_v21, %v1302_v19  ;;  %v827_v24 = vsel %vm795_vm12, %v1301_v18, %v811_v20 }
 0x1d5   : > { %v1305_v25 = vpop.f32.mrf.mxu1  ;;  %v837_v26 = vpack.c.bf16 %v827_v24, %v826_v23 }
 0x1d6   : > { %v812_v28 = vmul.f32 0.01, %v1304_v22  ;;  %vm796_vm13 = vcmp.gt.f32.partialorder %v1304_v22, 0.0 }
 0x1d7   : > { %v1306_v27 = vpop.f32.mrf.mxu1  ;;  %1355 = vmatmul.mubr.bf16.gmra.mxu0 %v837_v26 }
 0x1d8   : > { %v1307_v29 = vadd.f32 %v1306_v27, %v1305_v25  ;;  %v828_v34 = vsel %vm796_vm13, %v1304_v22, %v812_v28 }
 0x1d9   : > { %v1308_v30 = vpop.f32.mrf.mxu1 }
 0x1da   : > { %vm797_vm14 = vcmp.gt.f32.partialorder %v1307_v29, 0.0  ;;  %v813_v31 = vmul.f32 0.01, %v1307_v29 }
 0x1db   : > { %v1309_v32 = vpop.f32.mrf.mxu1 }
 0x1dc   : > { %v1310_v33 = vadd.f32 %v1309_v32, %v1308_v30  ;;  %v829_v35 = vsel %vm797_vm14, %v1307_v29, %v813_v31 }
 0x1dd   : > { %v1311_v36 = vpop.f32.mrf.mxu1  ;;  %v838_v37 = vpack.c.bf16 %v829_v35, %v828_v34 }
 0x1de   : > { %v814_v39 = vmul.f32 0.01, %v1310_v33  ;;  %vm798_vm15 = vcmp.gt.f32.partialorder %v1310_v33, 0.0 }
 0x1df   : > { %v1312_v38 = vpop.f32.mrf.mxu1  ;;  %1358 = vmatprep.mubr.bf16.mxu0 %v838_v37 }
 0x1e0   : > { %v1313_v40 = vadd.f32 %v1312_v38, %v1311_v36  ;;  %v830_v42 = vsel %vm798_vm15, %v1310_v33, %v814_v39 }
 0x1e2   : > { %vm799_vm0 = vcmp.gt.f32.partialorder %v1313_v40, 0.0  ;;  %v815_v41 = vmul.f32 0.01, %v1313_v40 }
 0x1e4   : > { %v831_v43 = vsel %vm799_vm0, %v1313_v40, %v815_v41 }
 0x1e5   : > { %v839_v44 = vpack.c.bf16 %v831_v43, %v830_v42 }
 0x1e7   : > { %1359 = vmatmul.mubr.bf16.gmra.mxu0 %v839_v44 }
 0x277   : > { %v1348_v45 = vpop.f32.mrf.mxu0 }
 0x278   : > { %vm1003_vm1 = vcmp.gt.f32.partialorder %v1348_v45, 0.0  ;;  %v1019_v46 = vmul.f32 0.01, %v1348_v45 }
 0x279   : > { %v938_v48 = vpop.f32.mrf.mxu0 }
 0x27a   : > { %vm1001_vm2 = vcmp.gt.f32.partialorder %v938_v48, 0.0  ;;  %v1017_v49 = vmul.f32 0.01, %v938_v48  ;;  %v1035_v50 = vsel %vm1003_vm1, %v1348_v45, %v1019_v46 }
 0x27b   : > { %v1349_v51 = vpop.f32.mrf.mxu0  ;;  %v1058_v52 = vmul.f32 %v1567_v47, %v1035_v50 }
 0x27c   : > { %vm1004_vm4 = vcmp.gt.f32.partialorder %v1349_v51, 0.0  ;;  %v1020_v53 = vmul.f32 0.01, %v1349_v51  ;;  %v1033_v54 = vsel %vm1001_vm2, %v938_v48, %v1017_v49  ;;  %vm1121_vm2 = vcmask 7168  }
 0x27d   : > { %v941_v55 = vpop.f32.mrf.mxu0  ;;  %v1079_v56 = vsel %vm1072_vm3, %v1058_v52, 0.0  ;;  %v1056_v57 = vmul.f32 %v1567_v47, %v1033_v54 }
 0x27e   : > { %vm1002_vm5 = vcmp.gt.f32.partialorder %v941_v55, 0.0  ;;  %v1018_v58 = vmul.f32 0.01, %v941_v55  ;;  %1080 = vadd.xlane.f32.xlu1 %v1079_v56  ;;  %v1036_v59 = vsel %vm1004_vm4, %v1349_v51, %v1020_v53 }
 0x27f   : > { %v1073_v60 = vsel %vm1072_vm3, %v1056_v57, 0.0  ;;  %v1059_v61 = vmul.f32 %v1567_v47, %v1036_v59 }
 0x280   : > { %1074 = vadd.xlane.f32.xlu0 %v1073_v60  ;;  %v1034_v62 = vsel %vm1002_vm5, %v941_v55, %v1018_v58 }
 0x281   : > { %v1082_v63 = vsel %vm1072_vm3, %v1059_v61, 0.0  ;;  %v1057_v0 = vmul.f32 %v1567_v47, %v1034_v62 }
 0x282   : > { %1083 = vadd.xlane.f32.xlu1 %v1082_v63 }
 0x283   : > { %v1076_v1 = vsel %vm1072_vm3, %v1057_v0, 0.0 }
 0x284   : > { %1077 = vadd.xlane.f32.xlu0 %v1076_v1 }
 0x287   : > { %v1352_v2 = vpop.f32.mrf.mxu0 }
 0x288   : > { %vm1007_vm6 = vcmp.gt.f32.partialorder %v1352_v2, 0.0  ;;  %v1023_v3 = vmul.f32 0.01, %v1352_v2 }
 0x289   : > { %v954_v4 = vpop.f32.mrf.mxu0 }
 0x28a   : > { %vm1005_vm7 = vcmp.gt.f32.partialorder %v954_v4, 0.0  ;;  %v1021_v5 = vmul.f32 0.01, %v954_v4  ;;  %v1039_v6 = vsel %vm1007_vm6, %v1352_v2, %v1023_v3 }
 0x28b   : > { %v1353_v7 = vpop.f32.mrf.mxu0  ;;  %v1062_v8 = vmul.f32 %v1567_v47, %v1039_v6 }
 0x28c   : > { %vm1008_vm8 = vcmp.gt.f32.partialorder %v1353_v7, 0.0  ;;  %v1024_v9 = vmul.f32 0.01, %v1353_v7  ;;  %v1037_v10 = vsel %vm1005_vm7, %v954_v4, %v1021_v5 }
 0x28d   : > { %v957_v11 = vpop.f32.mrf.mxu0  ;;  %v1091_v12 = vsel %vm1072_vm3, %v1062_v8, 0.0  ;;  %v1060_v13 = vmul.f32 %v1567_v47, %v1037_v10 }
 0x28e   : > { %vm1006_vm9 = vcmp.gt.f32.partialorder %v957_v11, 0.0  ;;  %v1022_v14 = vmul.f32 0.01, %v957_v11  ;;  %1092 = vadd.xlane.f32.xlu0 %v1091_v12  ;;  %v1040_v15 = vsel %vm1008_vm8, %v1353_v7, %v1024_v9 }
 0x28f   : > { %v1063_v16 = vmul.f32 %v1567_v47, %v1040_v15  ;;  %v1085_v18 = vsel %vm1072_vm3, %v1060_v13, 0.0 }
 0x290   : > { %v1038_v17 = vsel %vm1006_vm9, %v957_v11, %v1022_v14 }
 0x291   : > { %v1094_v19 = vsel %vm1072_vm3, %v1063_v16, 0.0  ;;  %v1061_v20 = vmul.f32 %v1567_v47, %v1038_v17 }
 0x292   : > { %1086 = vadd.xlane.f32.xlu0 %v1085_v18  ;;  %1095 = vadd.xlane.f32.xlu1 %v1094_v19 }
 0x293   : > { %v1088_v21 = vsel %vm1072_vm3, %v1061_v20, 0.0 }
 0x296   : > { %1089 = vadd.xlane.f32.xlu1 %v1088_v21 }
 0x297   : > { %v1356_v22 = vpop.f32.mrf.mxu0 }
 0x298   : > { %vm1011_vm10 = vcmp.gt.f32.partialorder %v1356_v22, 0.0  ;;  %v1027_v23 = vmul.f32 0.01, %v1356_v22 }
 0x299   : > { %v970_v24 = vpop.f32.mrf.mxu0 }
 0x29a   : > { %vm1009_vm11 = vcmp.gt.f32.partialorder %v970_v24, 0.0  ;;  %v1025_v25 = vmul.f32 0.01, %v970_v24  ;;  %v1043_v26 = vsel %vm1011_vm10, %v1356_v22, %v1027_v23 }
 0x29b   : > { %v1357_v27 = vpop.f32.mrf.mxu0  ;;  %v1066_v28 = vmul.f32 %v1567_v47, %v1043_v26 }
 0x29c   : > { %vm1012_vm12 = vcmp.gt.f32.partialorder %v1357_v27, 0.0  ;;  %v1028_v29 = vmul.f32 0.01, %v1357_v27  ;;  %v1041_v30 = vsel %vm1009_vm11, %v970_v24, %v1025_v25 }
 0x29d   : > { %v973_v31 = vpop.f32.mrf.mxu0  ;;  %v1103_v32 = vsel %vm1072_vm3, %v1066_v28, 0.0  ;;  %v1064_v33 = vmul.f32 %v1567_v47, %v1041_v30 }
 0x29e   : > { %vm1010_vm13 = vcmp.gt.f32.partialorder %v973_v31, 0.0  ;;  %v1026_v34 = vmul.f32 0.01, %v973_v31  ;;  %1104 = vadd.xlane.f32.xlu0 %v1103_v32  ;;  %v1044_v35 = vsel %vm1012_vm12, %v1357_v27, %v1028_v29 }
 0x29f   : > { %v1067_v36 = vmul.f32 %v1567_v47, %v1044_v35  ;;  %v1097_v38 = vsel %vm1072_vm3, %v1064_v33, 0.0 }
 0x2a0   : > { %v1042_v37 = vsel %vm1010_vm13, %v973_v31, %v1026_v34 }
 0x2a1   : > { %v1106_v39 = vsel %vm1072_vm3, %v1067_v36, 0.0  ;;  %v1065_v40 = vmul.f32 %v1567_v47, %v1042_v37 }
 0x2a2   : > { %1098 = vadd.xlane.f32.xlu0 %v1097_v38  ;;  %1107 = vadd.xlane.f32.xlu1 %v1106_v39 }
 0x2a3   : > { %v1100_v41 = vsel %vm1072_vm3, %v1065_v40, 0.0 }
 0x2a6   : > { %1101 = vadd.xlane.f32.xlu1 %v1100_v41 }
 0x2a7   : > { %v1360_v42 = vpop.f32.mrf.mxu0 }
 0x2a8   : > { %v1031_v43 = vmul.f32 0.01, %v1360_v42  ;;  %vm1015_vm14 = vcmp.gt.f32.partialorder %v1360_v42, 0.0 }
 0x2a9   : > { %v986_v44 = vpop.f32.mrf.mxu0 }
 0x2aa   : > { %vm1013_vm15 = vcmp.gt.f32.partialorder %v986_v44, 0.0  ;;  %v1029_v45 = vmul.f32 0.01, %v986_v44  ;;  %v1047_v50 = vsel %vm1015_vm14, %v1360_v42, %v1031_v43 }
 0x2ab   : > { %v1361_v46 = vpop.f32.mrf.mxu0  ;;  %v1070_v55 = vmul.f32 %v1567_v47, %v1047_v50 }
 0x2ac   : > { %v1032_v48 = vmul.f32 0.01, %v1361_v46  ;;  %v1045_v49 = vsel %vm1013_vm15, %v986_v44, %v1029_v45  ;;  %vm1016_vm0 = vcmp.gt.f32.partialorder %v1361_v46, 0.0 }
 0x2ad   : > { %v989_v51 = vpop.f32.mrf.mxu0  ;;  %v1068_v52 = vmul.f32 %v1567_v47, %v1045_v49  ;;  %v1115_v59 = vsel %vm1072_vm3, %v1070_v55, 0.0 }
 0x2ae   : > { %vm1014_vm1 = vcmp.gt.f32.partialorder %v989_v51, 0.0  ;;  %v1030_v53 = vmul.f32 0.01, %v989_v51  ;;  %v1048_v57 = vsel %vm1016_vm0, %v1361_v46, %v1032_v48 }
 0x2af   : > { %v1109_v54 = vsel %vm1072_vm3, %v1068_v52, 0.0  ;;  %v1071_v61 = vmul.f32 %v1567_v47, %v1048_v57 }
 0x2b0   : > { %v1046_v56 = vsel %vm1014_vm1, %v989_v51, %v1030_v53  ;;  %1110 = vadd.xlane.f32.xlu0 %v1109_v54 }
 0x2b1   : > { %v1069_v58 = vmul.f32 %v1567_v47, %v1046_v56  ;;  %v1118_v62 = vsel %vm1072_vm3, %v1071_v61, 0.0 }
 0x2b3   : > { %v1112_v60 = vsel %vm1072_vm3, %v1069_v58, 0.0 }
 0x2b4   : > { %1116 = vadd.xlane.f32.xlu0 %v1115_v59  ;;  %1113 = vadd.xlane.f32.xlu1 %v1112_v60 }
 0x2b8   : > { %1119 = vadd.xlane.f32.xlu1 %v1118_v62 }
 0x307   : > { %v1081_v47 = vpop.xlane.xlu1 %1080 }
 0x308   : > { %1124 = vst.msk [vmem:[%s1605_s15 + $0x10] sm:$0xff] %vm1121_vm2, %v1081_v47 }
 0x309   : > { %v1075_v63 = vpop.xlane.xlu0 %1074 }
 0x30a   : > { %1122 = vst.msk [vmem:[%s1605_s15] sm:$0xff] %vm1121_vm2, %v1075_v63 }
 0x30b   : > { %v1084_v0 = vpop.xlane.xlu1 %1083 }
 0x30c   : > { %1125 = vst.msk [vmem:[%s1605_s15 + $0x18] sm:$0xff] %vm1121_vm2, %v1084_v0 }
 0x30d   : > { %v1078_v1 = vpop.xlane.xlu0 %1077 }
 0x30e   : > { %1123 = vst.msk [vmem:[%s1605_s15 + $0x8] sm:$0xff] %vm1121_vm2, %v1078_v1 }
 0x317   : > { %v1093_v2 = vpop.xlane.xlu0 %1092 }
 0x318   : > { %1128 = vst.msk [vmem:[%s1605_s15 + $0x30] sm:$0xff] %vm1121_vm2, %v1093_v2 }
 0x31b   : > { %v1087_v3 = vpop.xlane.xlu0 %1086  ;;  %v1096_v4 = vpop.xlane.xlu1 %1095 }
 0x31c   : > { %1126 = vst.msk [vmem:[%s1605_s15 + $0x20] sm:$0xff] %vm1121_vm2, %v1087_v3  ;;  %1129 = vst.msk [vmem:[%s1605_s15 + $0x38] sm:$0xff] %vm1121_vm2, %v1096_v4 }
 0x31f   : > { %v1090_v5 = vpop.xlane.xlu1 %1089 }
 0x320   : > { %1127 = vst.msk [vmem:[%s1605_s15 + $0x28] sm:$0xff] %vm1121_vm2, %v1090_v5 }
 0x327   : > { %v1105_v6 = vpop.xlane.xlu0 %1104 }
 0x328   : > { %1132 = vst.msk [vmem:[%s1605_s15 + $0x50] sm:$0xff] %vm1121_vm2, %v1105_v6 }
 0x32b   : > { %v1099_v7 = vpop.xlane.xlu0 %1098  ;;  %v1108_v8 = vpop.xlane.xlu1 %1107 }
 0x32c   : > { %1130 = vst.msk [vmem:[%s1605_s15 + $0x40] sm:$0xff] %vm1121_vm2, %v1099_v7  ;;  %1133 = vst.msk [vmem:[%s1605_s15 + $0x58] sm:$0xff] %vm1121_vm2, %v1108_v8 }
 0x32f   : > { %v1102_v9 = vpop.xlane.xlu1 %1101 }
 0x330   : > { %1131 = vst.msk [vmem:[%s1605_s15 + $0x48] sm:$0xff] %vm1121_vm2, %v1102_v9 }
 0x339   : > { %v1111_v10 = vpop.xlane.xlu0 %1110 }
 0x33a   : > { %1134 = vst.msk [vmem:[%s1605_s15 + $0x60] sm:$0xff] %vm1121_vm2, %v1111_v10 }
 0x33d   : > { %v1117_v11 = vpop.xlane.xlu0 %1116  ;;  %v1114_v12 = vpop.xlane.xlu1 %1113 }
 0x33e   : > { %1136 = vst.msk [vmem:[%s1605_s15 + $0x70] sm:$0xff] %vm1121_vm2, %v1117_v11  ;;  %1135 = vst.msk [vmem:[%s1605_s15 + $0x68] sm:$0xff] %vm1121_vm2, %v1114_v12 }
 0x341   : > { %v1120_v13 = vpop.xlane.xlu1 %1119 }
 0x342   : > { %1137 = vst.msk [vmem:[%s1605_s15 + $0x78] sm:$0xff] %vm1121_vm2, %v1120_v13 }
 0x343 PF: > { %s15_s18 = sadd.s32 1, %s1415_s18  }
 0x344   : > { %p12_p4 = scmp.ge.s32.totalorder %s15_s18, 4  }
 0x346   :  { %14 = sbr.rel (!%p12_p4) target bundleno = 1 (0x1), region = 70 }

</bundles_post_ra>
